<compile_context>
chip_gen: v7x
topology: tpu7x:2x2x1
jax: 0.10.0
libtpu: 0.0.40
codegen_flags: <defaults>
</compile_context>

<pallas_src>
import functools

import jax
import jax.numpy as jnp
from jax.experimental import pallas as pl
from jax.experimental.pallas import tpu as pltpu

LANE = 128
SUBLANE = 8


def _round_up(x, m):
    return ((x + m - 1) // m) * m


def _pad_to(x, shape):
    return jnp.pad(x, [(0, s - d) for d, s in zip(x.shape, shape)])


def classifier_kernel(seq_ref, mask_ref, cond_ref, y1h_ref,
                      twenc_ref, benc_ref, vattn_ref,
                      w1m_ref, w1c_ref, b1_ref, w2_ref, b2_ref,
                      predict_ref, loss_ref, attn_ref,
                      *, n_classes, batch_total):
    bt, Tp = seq_ref.shape
    Vp, Hp = twenc_ref.shape
    f32, bf16 = jnp.float32, jnp.bfloat16

    # ---- embedder + encoder fused: hseq = tanh(onehot(ids) @ (table @ Wenc) + benc) ----
    # (table @ Wenc) is pre-folded on the host; exact since one-hot rows are 0/1.
    ids = seq_ref[...]                                                 # (bt, Tp) int32
    onehot = (jax.lax.broadcasted_iota(jnp.int32, (bt, Tp, Vp), 2)
              == ids[:, :, None]).astype(bf16)                         # (bt, Tp, Vp)
    onehot2 = onehot.reshape(bt * Tp, Vp)        # collapse leading dims (lane dim kept)
    hseq2 = jnp.tanh(
        jnp.dot(onehot2, twenc_ref[...], preferred_element_type=f32)
        + benc_ref[...])                                               # (bt*Tp, Hp) f32
    hseq3 = hseq2.reshape(bt, Tp, Hp)            # split leading dim (lane dim kept)

    # ---- attention scores: VPU multiply + lane reduce; masked softmax over T ----
    scores = jnp.sum(hseq3 * vattn_ref[...], axis=-1)                  # (bt, Tp) f32
    valid = mask_ref[...] > 0.0
    scores = jnp.where(valid, scores, jnp.full_like(scores, -1e9))
    m = jnp.max(scores, axis=-1, keepdims=True)
    e = jnp.where(valid, jnp.exp(scores - m), jnp.zeros_like(scores))
    denom = jnp.maximum(jnp.sum(e, axis=-1, keepdims=True), 1e-20)     # all-masked guard
    attn = e / denom                 # exact divide: rows sum to 1 (PyTorch parity)
    attn_ref[...] = attn

    # ---- mix = bmm(attn.unsqueeze(1), hseq).squeeze(1) as an f32 weighted sum over T ----
    mix = jnp.sum(attn[:, :, None] * hseq3, axis=1)                    # (bt, Hp) f32

    # ---- decoder (structured concat implemented as the identical split matmul) ----
    hid = jnp.maximum(
        jnp.dot(mix.astype(bf16), w1m_ref[...], preferred_element_type=f32)
        + jnp.dot(cond_ref[...], w1c_ref[...], preferred_element_type=f32)
        + b1_ref[...], 0.0)                                            # (bt, Dp) f32
    logits = (jnp.dot(hid.astype(bf16), w2_ref[...], preferred_element_type=f32)
              + b2_ref[...])                                           # (bt, Cp) f32

    # padded class columns carry zero weights (logit 0); mask them out of the softmax
    cls = jax.lax.broadcasted_iota(jnp.int32, logits.shape, 1)
    logits = jnp.where(cls < n_classes, logits, jnp.full_like(logits, -1e9))

    # ---- predictor: softmax probabilities + mean cross-entropy ----
    lmax = jnp.max(logits, axis=-1, keepdims=True)
    lse = jnp.log(jnp.sum(jnp.exp(logits - lmax), axis=-1, keepdims=True)) + lmax
    logp = logits - lse
    predict_ref[...] = jnp.exp(logp)
    # lane-dense per-tile / per-class loss partial (scaled by 1/B_total);
    # finished with a trivial sum in JAX.
    loss_ref[...] = (-jnp.sum(y1h_ref[...] * logp, axis=0, keepdims=True)
                     * (1.0 / batch_total))
    # TODO(synk): optional per-example `weight` in the predictor and `data.depad(attn)`
    # are host-side glue and are not implemented in the kernel.


def prepare_params(emb_table, params):
    """Fold / pad / cast all weights ONCE (init-time), not per forward call."""
    V, E = emb_table.shape
    H = params["wenc"].shape[1]
    S = params["w1c"].shape[0]
    D = params["w1m"].shape[1]
    C = params["w2"].shape[1]
    Vp, Hp, Sp, Dp, Cp = (_round_up(x, LANE) for x in (V, H, S, D, C))
    f32, bf16 = jnp.float32, jnp.bfloat16

    # Fold embedding into the encoder weight: onehot @ table @ Wenc == onehot @ (table @ Wenc)
    table_wenc = emb_table.astype(f32) @ params["wenc"].astype(f32)     # (V, H) f32

    prepared = {
        "twenc": _pad_to(table_wenc, (Vp, Hp)).astype(bf16),
        "benc":  _pad_to(params["benc"].reshape(1, -1), (1, Hp)).astype(f32),
        "vattn": _pad_to(params["vattn"].reshape(1, -1), (1, Hp)).astype(f32),
        "w1m":   _pad_to(params["w1m"], (Hp, Dp)).astype(bf16),
        "w1c":   _pad_to(params["w1c"], (Sp, Dp)).astype(bf16),
        "b1":    _pad_to(params["b1"].reshape(1, -1), (1, Dp)).astype(f32),
        "w2":    _pad_to(params["w2"], (Dp, Cp)).astype(bf16),
        "b2":    _pad_to(params["b2"].reshape(1, -1), (1, Cp)).astype(f32),
    }
    prepared = jax.tree_util.tree_map(jax.device_put, prepared)
    dims = dict(V=V, E=E, H=H, S=S, D=D, C=C, Vp=Vp, Hp=Hp, Sp=Sp, Dp=Dp, Cp=Cp)
    return prepared, dims


def seq_classifier_forward(prepared, dims, seq, mask, cond, y1h, *, b_tiles=1):
    B, T = seq.shape
    C, Cp, Sp = dims["C"], dims["Cp"], dims["Sp"]
    f32, bf16 = jnp.float32, jnp.bfloat16

    # Time never sits on a matmul lane dim, so only pad T to the sublane multiple
    # (a no-op at T=16).  The attn output is a tiny masked (B, T) store — accepted.
    Tp = _round_up(T, SUBLANE)

    # Batch tiling: b_tiles=1 on v5e/v6e (single TensorCore, whole problem fits VMEM);
    # set b_tiles=2 on v7x with a large batch to shard the "parallel" axis over both TCs.
    assert B % b_tiles == 0, "batch must divide evenly over grid tiles"
    bt = B // b_tiles
    assert bt == B or bt % SUBLANE == 0, "per-tile batch must be sublane aligned"

    # Per-call padding only for the data tensors (weights were prepared at init).
    seq_p = _pad_to(seq.astype(jnp.int32), (B, Tp))
    mask_p = _pad_to(mask.astype(f32), (B, Tp))
    cond_p = _pad_to(cond.astype(f32), (B, Sp)).astype(bf16)
    y1h_p = _pad_to(y1h.astype(f32), (B, Cp))

    weight_keys = ("twenc", "benc", "vattn", "w1m", "w1c", "b1", "w2", "b2")
    inputs = (seq_p, mask_p, cond_p, y1h_p) + tuple(prepared[k] for k in weight_keys)

    def batch_spec(shape):     # blocks the leading batch axis over the grid
        nd = len(shape)
        return pl.BlockSpec((bt,) + shape[1:], lambda i: (i,) + (0,) * (nd - 1))

    def const_spec(shape):     # weights: same (full) block every grid step
        nd = len(shape)
        return pl.BlockSpec(shape, lambda i: (0,) * nd)

    in_specs = ([batch_spec(seq_p.shape), batch_spec(mask_p.shape),
                 batch_spec(cond_p.shape), batch_spec(y1h_p.shape)]
                + [const_spec(prepared[k].shape) for k in weight_keys])

    out_shapes = (
        jax.ShapeDtypeStruct((B, Cp), f32),        # predict (padded classes)
        jax.ShapeDtypeStruct((b_tiles, Cp), f32),  # per-tile/per-class loss partials
        jax.ShapeDtypeStruct((B, Tp), f32),        # attention (sublane-padded time)
    )
    out_specs = (batch_spec((B, Cp)),
                 pl.BlockSpec((1, Cp), lambda i: (i, 0)),
                 batch_spec((B, Tp)))

    predict_p, loss_parts, attn_p = pl.pallas_call(
        functools.partial(classifier_kernel, n_classes=C, batch_total=B),
        out_shape=out_shapes,
        grid_spec=pltpu.PrefetchScalarGridSpec(
            num_scalar_prefetch=0,
            grid=(b_tiles,),
            in_specs=in_specs,
            out_specs=out_specs,
        ),
        compiler_params=pltpu.CompilerParams(
            dimension_semantics=("parallel",)),     # batch tiles are independent
    )(*inputs)

    loss = jnp.sum(loss_parts)                      # finish the mean-CE reduction in JAX
    return predict_p[:, :C], loss, attn_p[:, :T]


def reference_forward(emb_table, seq, mask, cond, y1h, params):
    """Pure-JAX f32 reference of the same forward pass."""
    emb = jnp.take(emb_table, seq, axis=0)                            # (B, T, E)
    hseq = jnp.tanh(emb @ params["wenc"] + params["benc"])            # (B, T, H)
    scores = jnp.squeeze(hseq @ params["vattn"], -1)                  # (B, T)
    valid = mask > 0.0
    scores = jnp.where(valid, scores, -1e9)
    e = jnp.where(valid, jnp.exp(scores - scores.max(-1, keepdims=True)), 0.0)
    attn = e / e.sum(-1, keepdims=True)
    mix = jnp.einsum('bt,bth->bh', attn, hseq)
    hid = jax.nn.relu(mix @ params["w1m"] + cond @ params["w1c"] + params["b1"])
    logits = hid @ params["w2"] + params["b2"]
    predict = jax.nn.softmax(logits, -1)
    logp = jax.nn.log_softmax(logits, -1)
    loss = -jnp.mean(jnp.sum(y1h * logp, -1))
    return predict, loss, attn


if __name__ == "__main__":
    V, B, T, E, H, S, D, C = 64, 8, 16, 32, 32, 16, 32, 8

    key = jax.random.PRNGKey(0)
    keys = jax.random.split(key, 12)

    params = {
        "wenc":  jax.random.normal(keys[0], (E, H), jnp.float32) * 0.1,
        "benc":  jax.random.normal(keys[1], (1, H), jnp.float32) * 0.01,
        "vattn": jax.random.normal(keys[2], (H, 1), jnp.float32) * 0.1,
        "w1m":   jax.random.normal(keys[3], (H, D), jnp.float32) * 0.1,
        "w1c":   jax.random.normal(keys[4], (S, D), jnp.float32) * 0.1,
        "b1":    jax.random.normal(keys[5], (1, D), jnp.float32) * 0.01,
        "w2":    jax.random.normal(keys[6], (D, C), jnp.float32) * 0.1,
        "b2":    jax.random.normal(keys[7], (1, C), jnp.float32) * 0.01,
    }
    emb_table = jax.random.normal(keys[8], (V, E), jnp.float32) * 0.1

    seq = jax.random.randint(keys[9], (B, T), 0, V)                    # token ids
    lengths = jax.random.randint(keys[10], (B,), 4, T + 1)             # valid lengths
    mask = (jnp.arange(T)[None, :] < lengths[:, None]).astype(jnp.float32)
    cond = jax.random.normal(keys[11], (B, S), jnp.float32)            # structured data
    y = jax.random.randint(jax.random.PRNGKey(1), (B,), 0, C)
    y1h = jax.nn.one_hot(y, C, dtype=jnp.float32)

    # init-time: fold / pad / cast weights once
    prepared, dims = prepare_params(emb_table, params)

    predict, loss, attn = seq_classifier_forward(prepared, dims, seq, mask, cond, y1h)
    jax.block_until_ready((predict, loss, attn))

    assert predict.shape == (B, C) and attn.shape == (B, T) and loss.shape == ()

    pred_r, loss_r, attn_r = reference_forward(emb_table, seq, mask, cond, y1h, params)
    assert float(jnp.max(jnp.abs(predict - pred_r))) < 2e-2, "predict mismatch"
    assert float(jnp.max(jnp.abs(attn - attn_r))) < 2e-2, "attention mismatch"
    assert abs(float(loss) - float(loss_r)) < 5e-2, "loss mismatch"

    print("KERNEL_OK")
</pallas_src>

<mosaic_0001>
module attributes {stable_mosaic.version = 11 : i64} {
  func.func @classifier_kernel(%arg0: i32, %arg1: memref<8x16xi32, #tpu.memory_space<vmem>>, %arg2: memref<8x16xf32, #tpu.memory_space<vmem>>, %arg3: memref<8x128xbf16, #tpu.memory_space<vmem>>, %arg4: memref<8x128xf32, #tpu.memory_space<vmem>>, %arg5: memref<128x128xbf16, #tpu.memory_space<vmem>>, %arg6: memref<1x128xf32, #tpu.memory_space<vmem>>, %arg7: memref<1x128xf32, #tpu.memory_space<vmem>>, %arg8: memref<128x128xbf16, #tpu.memory_space<vmem>>, %arg9: memref<128x128xbf16, #tpu.memory_space<vmem>>, %arg10: memref<1x128xf32, #tpu.memory_space<vmem>>, %arg11: memref<128x128xbf16, #tpu.memory_space<vmem>>, %arg12: memref<1x128xf32, #tpu.memory_space<vmem>>, %arg13: memref<8x128xf32, #tpu.memory_space<vmem>>, %arg14: memref<1x128xf32, #tpu.memory_space<vmem>>, %arg15: memref<8x16xf32, #tpu.memory_space<vmem>>) attributes {dimension_semantics = [#tpu.dimension_semantics<parallel>], iteration_bounds = array<i64: 1>, scalar_prefetch = 0 : i64, scratch_operands = 0 : i64, tpu.core_type = #tpu.core_type<tc>, window_params = [{transform_indices = @transform_0, window_bounds = array<i64: 8, 16>}, {transform_indices = @transform_1, window_bounds = array<i64: 8, 16>}, {transform_indices = @transform_2, window_bounds = array<i64: 8, 128>}, {transform_indices = @transform_3, window_bounds = array<i64: 8, 128>}, {pipeline_mode = #tpu.pipeline_mode<synchronous>, transform_indices = @transform_4, window_bounds = array<i64: 128, 128>}, {pipeline_mode = #tpu.pipeline_mode<synchronous>, transform_indices = @transform_5, window_bounds = array<i64: 1, 128>}, {pipeline_mode = #tpu.pipeline_mode<synchronous>, transform_indices = @transform_6, window_bounds = array<i64: 1, 128>}, {pipeline_mode = #tpu.pipeline_mode<synchronous>, transform_indices = @transform_7, window_bounds = array<i64: 128, 128>}, {pipeline_mode = #tpu.pipeline_mode<synchronous>, transform_indices = @transform_8, window_bounds = array<i64: 128, 128>}, {pipeline_mode = #tpu.pipeline_mode<synchronous>, transform_indices = @transform_9, window_bounds = array<i64: 1, 128>}, {pipeline_mode = #tpu.pipeline_mode<synchronous>, transform_indices = @transform_10, window_bounds = array<i64: 128, 128>}, {pipeline_mode = #tpu.pipeline_mode<synchronous>, transform_indices = @transform_11, window_bounds = array<i64: 1, 128>}, {transform_indices = @transform_12, window_bounds = array<i64: 8, 128>}, {transform_indices = @transform_13, window_bounds = array<i64: 1, 128>}, {transform_indices = @transform_14, window_bounds = array<i64: 8, 16>}]} {
    %c0 = arith.constant 0 : index
    %c0_0 = arith.constant 0 : index
    %0 = vector.load %arg1[%c0, %c0_0] : memref<8x16xi32, #tpu.memory_space<vmem>>, vector<8x16xi32>
    %1 = tpu.iota {dimensions = array<i32: 2>} : vector<8x16x128xi32>
    %2 = vector.shape_cast %0 : vector<8x16xi32> to vector<8x16x1xi32>
    %3 = vector.broadcast %2 : vector<8x16x1xi32> to vector<8x16x128xi32>
    %4 = arith.cmpi eq, %1, %3 : vector<8x16x128xi32>
    %5 = arith.extui %4 : vector<8x16x128xi1> to vector<8x16x128xi32>
    %6 = arith.sitofp %5 : vector<8x16x128xi32> to vector<8x16x128xf32>
    %7 = arith.truncf %6 : vector<8x16x128xf32> to vector<8x16x128xbf16>
    %8 = vector.shape_cast %7 : vector<8x16x128xbf16> to vector<128x128xbf16>
    %c0_1 = arith.constant 0 : index
    %c0_2 = arith.constant 0 : index
    %9 = vector.load %arg5[%c0_1, %c0_2] : memref<128x128xbf16, #tpu.memory_space<vmem>>, vector<128x128xbf16>
    %cst = arith.constant dense<0.000000e+00> : vector<128x128xf32>
    %10 = tpu.matmul %8, %9, %cst {dimension_numbers = #tpu.dot_dimension_numbers<[1], [0], [0], [1], [0, 0, 1, 1], [], []>} : vector<128x128xbf16>, vector<128x128xbf16>, vector<128x128xf32> -> vector<128x128xf32>
    %c0_3 = arith.constant 0 : index
    %c0_4 = arith.constant 0 : index
    %11 = vector.load %arg6[%c0_3, %c0_4] : memref<1x128xf32, #tpu.memory_space<vmem>>, vector<1x128xf32>
    %12 = vector.broadcast %11 : vector<1x128xf32> to vector<128x128xf32>
    %13 = arith.addf %10, %12 : vector<128x128xf32>
    %14 = math.tanh %13 : vector<128x128xf32>
    %15 = vector.shape_cast %14 : vector<128x128xf32> to vector<8x16x128xf32>
    %c0_5 = arith.constant 0 : index
    %c0_6 = arith.constant 0 : index
    %16 = vector.load %arg7[%c0_5, %c0_6] : memref<1x128xf32, #tpu.memory_space<vmem>>, vector<1x128xf32>
    %17 = vector.shape_cast %16 : vector<1x128xf32> to vector<1x1x128xf32>
    %18 = vector.broadcast %17 : vector<1x1x128xf32> to vector<8x16x128xf32>
    %19 = arith.mulf %15, %18 : vector<8x16x128xf32>
    %cst_7 = arith.constant dense<0.000000e+00> : vector<8x16xf32>
    %20 = vector.multi_reduction <add>, %19, %cst_7 [2] : vector<8x16x128xf32> to vector<8x16xf32>
    %c0_8 = arith.constant 0 : index
    %c0_9 = arith.constant 0 : index
    %21 = vector.load %arg2[%c0_8, %c0_9] : memref<8x16xf32, #tpu.memory_space<vmem>>, vector<8x16xf32>
    %cst_10 = arith.constant 0.000000e+00 : f32
    %22 = vector.broadcast %cst_10 : f32 to vector<8x16xf32>
    %23 = arith.cmpf ogt, %21, %22 : vector<8x16xf32>
    %cst_11 = arith.constant -1.000000e+09 : f32
    %24 = vector.broadcast %cst_11 : f32 to vector<8x16xf32>
    %25 = arith.select %23, %20, %24 : vector<8x16xi1>, vector<8x16xf32>
    %cst_12 = arith.constant dense<0xFF800000> : vector<8xf32>
    %26 = vector.multi_reduction <maximumf>, %25, %cst_12 [1] : vector<8x16xf32> to vector<8xf32>
    %27 = vector.shape_cast %26 : vector<8xf32> to vector<8x1xf32>
    %28 = vector.broadcast %27 : vector<8x1xf32> to vector<8x16xf32>
    %29 = arith.subf %25, %28 : vector<8x16xf32>
    %30 = math.exp %29 : vector<8x16xf32>
    %cst_13 = arith.constant 0.000000e+00 : f32
    %31 = vector.broadcast %cst_13 : f32 to vector<8x16xf32>
    %32 = arith.select %23, %30, %31 : vector<8x16xi1>, vector<8x16xf32>
    %cst_14 = arith.constant dense<0.000000e+00> : vector<8xf32>
    %33 = vector.multi_reduction <add>, %32, %cst_14 [1] : vector<8x16xf32> to vector<8xf32>
    %34 = vector.shape_cast %33 : vector<8xf32> to vector<8x1xf32>
    %cst_15 = arith.constant 9.99999968E-21 : f32
    %35 = vector.broadcast %cst_15 : f32 to vector<8x1xf32>
    %36 = arith.maximumf %34, %35 : vector<8x1xf32>
    %37 = vector.broadcast %36 : vector<8x1xf32> to vector<8x16xf32>
    %38 = arith.divf %32, %37 : vector<8x16xf32>
    %c0_16 = arith.constant 0 : index
    %c0_17 = arith.constant 0 : index
    %39 = vector.load %arg15[%c0_16, %c0_17] : memref<8x16xf32, #tpu.memory_space<vmem>>, vector<8x16xf32>
    tpu.vector_store %arg15[%c0_16, %c0_17], %38 {strides = array<i32>} : memref<8x16xf32, #tpu.memory_space<vmem>>, vector<8x16xf32>,
    %40 = vector.shape_cast %38 : vector<8x16xf32> to vector<8x16x1xf32>
    %41 = vector.broadcast %40 : vector<8x16x1xf32> to vector<8x16x128xf32>
    %42 = arith.mulf %41, %15 : vector<8x16x128xf32>
    %cst_18 = arith.constant dense<0.000000e+00> : vector<8x128xf32>
    %43 = vector.multi_reduction <add>, %42, %cst_18 [1] : vector<8x16x128xf32> to vector<8x128xf32>
    %44 = arith.truncf %43 : vector<8x128xf32> to vector<8x128xbf16>
    %c0_19 = arith.constant 0 : index
    %c0_20 = arith.constant 0 : index
    %45 = vector.load %arg8[%c0_19, %c0_20] : memref<128x128xbf16, #tpu.memory_space<vmem>>, vector<128x128xbf16>
    %cst_21 = arith.constant dense<0.000000e+00> : vector<8x128xf32>
    %46 = tpu.matmul %44, %45, %cst_21 {dimension_numbers = #tpu.dot_dimension_numbers<[1], [0], [0], [1], [0, 0, 1, 1], [], []>} : vector<8x128xbf16>, vector<128x128xbf16>, vector<8x128xf32> -> vector<8x128xf32>
    %c0_22 = arith.constant 0 : index
    %c0_23 = arith.constant 0 : index
    %47 = vector.load %arg3[%c0_22, %c0_23] : memref<8x128xbf16, #tpu.memory_space<vmem>>, vector<8x128xbf16>
    %c0_24 = arith.constant 0 : index
    %c0_25 = arith.constant 0 : index
    %48 = vector.load %arg9[%c0_24, %c0_25] : memref<128x128xbf16, #tpu.memory_space<vmem>>, vector<128x128xbf16>
    %cst_26 = arith.constant dense<0.000000e+00> : vector<8x128xf32>
    %49 = tpu.matmul %47, %48, %cst_26 {dimension_numbers = #tpu.dot_dimension_numbers<[1], [0], [0], [1], [0, 0, 1, 1], [], []>} : vector<8x128xbf16>, vector<128x128xbf16>, vector<8x128xf32> -> vector<8x128xf32>
    %50 = arith.addf %46, %49 : vector<8x128xf32>
    %c0_27 = arith.constant 0 : index
    %c0_28 = arith.constant 0 : index
    %51 = vector.load %arg10[%c0_27, %c0_28] : memref<1x128xf32, #tpu.memory_space<vmem>>, vector<1x128xf32>
    %52 = vector.broadcast %51 : vector<1x128xf32> to vector<8x128xf32>
    %53 = arith.addf %50, %52 : vector<8x128xf32>
    %cst_29 = arith.constant 0.000000e+00 : f32
    %54 = vector.broadcast %cst_29 : f32 to vector<8x128xf32>
    %55 = arith.maximumf %53, %54 : vector<8x128xf32>
    %56 = arith.truncf %55 : vector<8x128xf32> to vector<8x128xbf16>
    %c0_30 = arith.constant 0 : index
    %c0_31 = arith.constant 0 : index
    %57 = vector.load %arg11[%c0_30, %c0_31] : memref<128x128xbf16, #tpu.memory_space<vmem>>, vector<128x128xbf16>
    %cst_32 = arith.constant dense<0.000000e+00> : vector<8x128xf32>
    %58 = tpu.matmul %56, %57, %cst_32 {dimension_numbers = #tpu.dot_dimension_numbers<[1], [0], [0], [1], [0, 0, 1, 1], [], []>} : vector<8x128xbf16>, vector<128x128xbf16>, vector<8x128xf32> -> vector<8x128xf32>
    %c0_33 = arith.constant 0 : index
    %c0_34 = arith.constant 0 : index
    %59 = vector.load %arg12[%c0_33, %c0_34] : memref<1x128xf32, #tpu.memory_space<vmem>>, vector<1x128xf32>
    %60 = vector.broadcast %59 : vector<1x128xf32> to vector<8x128xf32>
    %61 = arith.addf %58, %60 : vector<8x128xf32>
    %62 = tpu.iota {dimensions = array<i32: 1>} : vector<8x128xi32>
    %c8_i32 = arith.constant 8 : i32
    %63 = vector.broadcast %c8_i32 : i32 to vector<8x128xi32>
    %64 = arith.cmpi slt, %62, %63 : vector<8x128xi32>
    %cst_35 = arith.constant -1.000000e+09 : f32
    %65 = vector.broadcast %cst_35 : f32 to vector<8x128xf32>
    %66 = arith.select %64, %61, %65 : vector<8x128xi1>, vector<8x128xf32>
    %cst_36 = arith.constant dense<0xFF800000> : vector<8xf32>
    %67 = vector.multi_reduction <maximumf>, %66, %cst_36 [1] : vector<8x128xf32> to vector<8xf32>
    %68 = vector.shape_cast %67 : vector<8xf32> to vector<8x1xf32>
    %69 = vector.broadcast %68 : vector<8x1xf32> to vector<8x128xf32>
    %70 = arith.subf %66, %69 : vector<8x128xf32>
    %71 = math.exp %70 : vector<8x128xf32>
    %cst_37 = arith.constant dense<0.000000e+00> : vector<8xf32>
    %72 = vector.multi_reduction <add>, %71, %cst_37 [1] : vector<8x128xf32> to vector<8xf32>
    %73 = vector.shape_cast %72 : vector<8xf32> to vector<8x1xf32>
    %74 = math.log %73 : vector<8x1xf32>
    %75 = arith.addf %74, %68 : vector<8x1xf32>
    %76 = vector.broadcast %75 : vector<8x1xf32> to vector<8x128xf32>
    %77 = arith.subf %66, %76 : vector<8x128xf32>
    %78 = math.exp %77 : vector<8x128xf32>
    %c0_38 = arith.constant 0 : index
    %c0_39 = arith.constant 0 : index
    %79 = vector.load %arg13[%c0_38, %c0_39] : memref<8x128xf32, #tpu.memory_space<vmem>>, vector<8x128xf32>
    tpu.vector_store %arg13[%c0_38, %c0_39], %78 {strides = array<i32>} : memref<8x128xf32, #tpu.memory_space<vmem>>, vector<8x128xf32>,
    %c0_40 = arith.constant 0 : index
    %c0_41 = arith.constant 0 : index
    %80 = vector.load %arg4[%c0_40, %c0_41] : memref<8x128xf32, #tpu.memory_space<vmem>>, vector<8x128xf32>
    %81 = arith.mulf %80, %77 : vector<8x128xf32>
    %cst_42 = arith.constant dense<0.000000e+00> : vector<128xf32>
    %82 = vector.multi_reduction <add>, %81, %cst_42 [0] : vector<8x128xf32> to vector<128xf32>
    %83 = vector.shape_cast %82 : vector<128xf32> to vector<1x128xf32>
    %cst_43 = arith.constant 0.000000e+00 : f32
    %84 = vector.broadcast %cst_43 : f32 to vector<1x128xf32>
    %85 = arith.subf %84, %83 : vector<1x128xf32>
    %cst_44 = arith.constant 1.250000e-01 : f32
    %86 = vector.broadcast %cst_44 : f32 to vector<1x128xf32>
    %87 = arith.mulf %85, %86 : vector<1x128xf32>
    %c0_45 = arith.constant 0 : index
    %c0_46 = arith.constant 0 : index
    %88 = vector.load %arg14[%c0_45, %c0_46] : memref<1x128xf32, #tpu.memory_space<vmem>>, vector<1x128xf32>
    tpu.vector_store %arg14[%c0_45, %c0_46], %87 {strides = array<i32>} : memref<1x128xf32, #tpu.memory_space<vmem>>, vector<1x128xf32>,
    return
  }
  func.func @transform_0(%arg0: i32) -> (i32, i32) {
    %c0_i32 = arith.constant 0 : i32
    %c0_i32_0 = arith.constant 0 : i32
    return %arg0, %c0_i32 : i32, i32
  }
  func.func @transform_1(%arg0: i32) -> (i32, i32) {
    %c0_i32 = arith.constant 0 : i32
    %c0_i32_0 = arith.constant 0 : i32
    return %arg0, %c0_i32 : i32, i32
  }
  func.func @transform_2(%arg0: i32) -> (i32, i32) {
    %c0_i32 = arith.constant 0 : i32
    %c0_i32_0 = arith.constant 0 : i32
    return %arg0, %c0_i32 : i32, i32
  }
  func.func @transform_3(%arg0: i32) -> (i32, i32) {
    %c0_i32 = arith.constant 0 : i32
    %c0_i32_0 = arith.constant 0 : i32
    return %arg0, %c0_i32 : i32, i32
  }
  func.func @transform_4(%arg0: i32) -> (i32, i32) {
    %c0_i32 = arith.constant 0 : i32
    %c0_i32_0 = arith.constant 0 : i32
    %c0_i32_1 = arith.constant 0 : i32
    return %c0_i32, %c0_i32_0 : i32, i32
  }
  func.func @transform_5(%arg0: i32) -> (i32, i32) {
    %c0_i32 = arith.constant 0 : i32
    %c0_i32_0 = arith.constant 0 : i32
    %c0_i32_1 = arith.constant 0 : i32
    return %c0_i32, %c0_i32_0 : i32, i32
  }
  func.func @transform_6(%arg0: i32) -> (i32, i32) {
    %c0_i32 = arith.constant 0 : i32
    %c0_i32_0 = arith.constant 0 : i32
    %c0_i32_1 = arith.constant 0 : i32
    return %c0_i32, %c0_i32_0 : i32, i32
  }
  func.func @transform_7(%arg0: i32) -> (i32, i32) {
    %c0_i32 = arith.constant 0 : i32
    %c0_i32_0 = arith.constant 0 : i32
    %c0_i32_1 = arith.constant 0 : i32
    return %c0_i32, %c0_i32_0 : i32, i32
  }
  func.func @transform_8(%arg0: i32) -> (i32, i32) {
    %c0_i32 = arith.constant 0 : i32
    %c0_i32_0 = arith.constant 0 : i32
    %c0_i32_1 = arith.constant 0 : i32
    return %c0_i32, %c0_i32_0 : i32, i32
  }
  func.func @transform_9(%arg0: i32) -> (i32, i32) {
    %c0_i32 = arith.constant 0 : i32
    %c0_i32_0 = arith.constant 0 : i32
    %c0_i32_1 = arith.constant 0 : i32
    return %c0_i32, %c0_i32_0 : i32, i32
  }
  func.func @transform_10(%arg0: i32) -> (i32, i32) {
    %c0_i32 = arith.constant 0 : i32
    %c0_i32_0 = arith.constant 0 : i32
    %c0_i32_1 = arith.constant 0 : i32
    return %c0_i32, %c0_i32_0 : i32, i32
  }
  func.func @transform_11(%arg0: i32) -> (i32, i32) {
    %c0_i32 = arith.constant 0 : i32
    %c0_i32_0 = arith.constant 0 : i32
    %c0_i32_1 = arith.constant 0 : i32
    return %c0_i32, %c0_i32_0 : i32, i32
  }
  func.func @transform_12(%arg0: i32) -> (i32, i32) {
    %c0_i32 = arith.constant 0 : i32
    %c0_i32_0 = arith.constant 0 : i32
    return %arg0, %c0_i32 : i32, i32
  }
  func.func @transform_13(%arg0: i32) -> (i32, i32) {
    %c0_i32 = arith.constant 0 : i32
    %c0_i32_0 = arith.constant 0 : i32
    return %arg0, %c0_i32 : i32, i32
  }
  func.func @transform_14(%arg0: i32) -> (i32, i32) {
    %c0_i32 = arith.constant 0 : i32
    %c0_i32_0 = arith.constant 0 : i32
    return %arg0, %c0_i32 : i32, i32
  }
}

</mosaic_0001>

<bundles_post_ra>
// kernel: tpu_custom_call.1
= control target key start
LH: loop header
LB: loop body
LE: loop exit
PB: predicated region body
PF: predicated region fallthrough
CT: control target
= control target key end

     0   :  { %20 = vsyncpa [#allocation3], 0  ;;  %s2232_s0 = inlined_call_operand.hbm [shape: s32[8,16], index: 0, kind: input, shape index: {}]   ;;  %s2233_s1 = inlined_call_operand.hbm [shape: f32[8,16], index: 1, kind: input, shape index: {}]   ;;  %s2234_s2 = inlined_call_operand.hbm [shape: bf16[8,128], index: 2, kind: input, shape index: {}]   ;;  %s2235_s3 = inlined_call_operand.vmem [shape: f32[8,128], index: 3, kind: input, shape index: {}]   ;;  %s2236_s4 = inlined_call_operand.hbm [shape: bf16[128,128], index: 4, kind: input, shape index: {}]   ;;  %s2237_s5 = inlined_call_operand.vmem [shape: f32[1,128], index: 5, kind: input, shape index: {}]   ;;  %s2238_s6 = inlined_call_operand.vmem [shape: f32[1,128], index: 6, kind: input, shape index: {}]   ;;  %s2239_s7 = inlined_call_operand.hbm [shape: bf16[128,128], index: 7, kind: input, shape index: {}]   ;;  %s2240_s8 = inlined_call_operand.hbm [shape: bf16[128,128], index: 8, kind: input, shape index: {}]   ;;  %s2241_s9 = inlined_call_operand.vmem [shape: f32[1,128], index: 9, kind: input, shape index: {}]   ;;  %s2242_s10 = inlined_call_operand.hbm [shape: bf16[128,128], index: 10, kind: input, shape index: {}]   ;;  %s2243_s11 = inlined_call_operand.vmem [shape: f32[1,128], index: 11, kind: input, shape index: {}]   ;;  %s2244_s12 = inlined_call_operand.hbm [shape: f32[8,128], index: 12, kind: output, shape index: {0}]   ;;  %s2245_s13 = inlined_call_operand.hbm [shape: f32[1,128], index: 13, kind: output, shape index: {1}]   ;;  %s2246_s14 = inlined_call_operand.hbm [shape: f32[8,16], index: 14, kind: output, shape index: {2}]  }
   0x1   :  { %21 = vsyncpa [#allocation6], 0 }
   0x2   :  { %22 = vsyncpa [#allocation9], 0 }
   0x3   :  { %23 = vsyncpa [#allocation12], 0 }
   0x4   :  { %24 = vsyncpa [#allocation4], 0 }
   0x5   :  { %25 = vsyncpa [#allocation16], 0  ;;  %s1764_s29 = smov [#allocation5]   ;;  %s1765_s15 = smov [#allocation8]  }
   0x6   :  { %s42_s30 = sshll.u32 %s1764_s29, 4  ;;  %s63_s16 = sshll.u32 %s1765_s15, 4  ;;  %s43_s30 = int_to_ptr.vmem [resolvable:$true] %s42_s30  ;;  %s1854_s16 = int_to_ptr.vmem [resolvable:$true] %s63_s16 }
   0x7   :  { %s1532_s19 = scalar_lea.hbm %s2233_s1, 128 }
   0x8   :  { %p1533_p0 = scmp.ne.s32.totalorder %s2233_s1, %s1532_s19  ;;  %p1536_p1 = scmp.lt.u32.totalorder %s1532_s19, %s2233_s1 }
   0xa   :  { %p1538_p2 = pnand %p1536_p1, %p1533_p0 }
   0xc   :  { %1541 = shalt.err (!%p1538_p2)
}
   0xd   :  { %s1542_s24 = scalar_lea.vmem %s43_s30, 128  ;;  %p1547_p4 = scmp.lt.s32.totalorder %s43_s30, %s43_s30 }
   0xe   :  { %p1543_p3 = scmp.ne.s32.totalorder %s43_s30, %s1542_s24  ;;  %p1548_p5 = scmp.lt.s32.totalorder %s1542_s24, %s1542_s24 }
  0x10   :  { %p1549_p6 = por %p1548_p5, %p1547_p4 }
  0x12   :  { %p1550_p7 = pnand %p1549_p6, %p1543_p3 }
  0x14   :  { %1553 = shalt.err (!%p1550_p7)
}
  0x15   :  { %45 = dma.hbm_to_vmem [thread:$0]  %s2233_s1, 128, %s43_s30, [#allocation6]  }
  0x16   :  { %s1554_s29 = scalar_lea.hbm %s2236_s4, 1024 }
  0x17   :  { %p1555_p8 = scmp.ne.s32.totalorder %s2236_s4, %s1554_s29  ;;  %p1558_p9 = scmp.lt.u32.totalorder %s1554_s29, %s2236_s4 }
  0x19   :  { %p1560_p10 = pnand %p1558_p9, %p1555_p8 }
  0x1b   :  { %1563 = shalt.err (!%p1560_p10)
}
  0x1c   :  { %s1564_s20 = scalar_lea.vmem %s1854_s16, 1024  ;;  %p1569_p12 = scmp.lt.s32.totalorder %s1854_s16, %s1854_s16 }
  0x1d   :  { %p1565_p11 = scmp.ne.s32.totalorder %s1854_s16, %s1564_s20  ;;  %p1570_p13 = scmp.lt.s32.totalorder %s1564_s20, %s1564_s20 }
  0x1f   :  { %p1571_p0 = por %p1570_p13, %p1569_p12 }
  0x21   :  { %p1572_p1 = pnand %p1571_p0, %p1565_p11 }
  0x23   :  { %1575 = shalt.err (!%p1572_p1)
}
  0x24   :  { %s1766_s1 = smov 64   ;;  %s1767_s30 = smov 4  }
  0x25   :  { %69 = dma.hbm_to_vmem [thread:$0]  %s2236_s4, 1024, %s1854_s16, [#allocation9], %s1766_s1, %s1766_s1, %s1767_s30  }
  0x26   :  { %s1768_s23 = smov [#allocation11]   ;;  %s1769_s25 = smov [#allocation2]  }
  0x27   :  { %s91_s24 = sshll.u32 %s1768_s23, 4  ;;  %s32_s26 = sshll.u32 %s1769_s25, 4  ;;  %s92_s24 = int_to_ptr.vmem [resolvable:$true] %s91_s24  ;;  %s33_s26 = int_to_ptr.vmem [resolvable:$true] %s32_s26 }
  0x28   :  { %s1576_s29 = scalar_lea.hbm %s2240_s8, 1024 }
  0x29   :  { %p1577_p2 = scmp.ne.s32.totalorder %s2240_s8, %s1576_s29  ;;  %p1580_p3 = scmp.lt.u32.totalorder %s1576_s29, %s2240_s8 }
  0x2b   :  { %p1582_p4 = pnand %p1580_p3, %p1577_p2 }
  0x2d   :  { %1585 = shalt.err (!%p1582_p4)
}
  0x2e   :  { %s1586_s4 = scalar_lea.vmem %s92_s24, 1024  ;;  %p1591_p6 = scmp.lt.s32.totalorder %s92_s24, %s92_s24 }
  0x2f   :  { %p1587_p5 = scmp.ne.s32.totalorder %s92_s24, %s1586_s4  ;;  %p1592_p7 = scmp.lt.s32.totalorder %s1586_s4, %s1586_s4 }
  0x31   :  { %p1593_p8 = por %p1592_p7, %p1591_p6 }
  0x33   :  { %p1594_p9 = pnand %p1593_p8, %p1587_p5 }
  0x35   :  { %1597 = shalt.err (!%p1594_p9)
}
  0x36   :  { %97 = dma.hbm_to_vmem [thread:$0]  %s2240_s8, 1024, %s92_s24, [#allocation12], %s1766_s1, %s1766_s1, %s1767_s30  }
  0x37   :  { %s1598_s23 = scalar_lea.hbm %s2232_s0, 128 }
  0x38   :  { %p1599_p10 = scmp.ne.s32.totalorder %s2232_s0, %s1598_s23  ;;  %p1602_p11 = scmp.lt.u32.totalorder %s1598_s23, %s2232_s0 }
  0x3a   :  { %p1604_p12 = pnand %p1602_p11, %p1599_p10 }
  0x3c   :  { %1607 = shalt.err (!%p1604_p12)
}
  0x3d   :  { %s1608_s15 = scalar_lea.vmem %s33_s26, 128  ;;  %p1613_p0 = scmp.lt.s32.totalorder %s33_s26, %s33_s26 }
  0x3e   :  { %p1609_p13 = scmp.ne.s32.totalorder %s33_s26, %s1608_s15  ;;  %p1614_p1 = scmp.lt.s32.totalorder %s1608_s15, %s1608_s15 }
  0x40   :  { %p1615_p2 = por %p1614_p1, %p1613_p0 }
  0x42   :  { %p1616_p3 = pnand %p1615_p2, %p1609_p13 }
  0x44   :  { %1619 = shalt.err (!%p1616_p3)
}
  0x45   :  { %35 = dma.hbm_to_vmem [thread:$0]  %s2232_s0, 128, %s33_s26, [#allocation3]  }
  0x46   :  { %s1770_s17 = smov [#allocation7]   ;;  %s1771_s19 = smov [#allocation10]  }
  0x47   :  { %s52_s18 = sshll.u32 %s1770_s17, 4  ;;  %s79_s4 = sshll.u32 %s1771_s19, 4  ;;  %s53_s18 = int_to_ptr.vmem [resolvable:$true] %s52_s18  ;;  %s1915_s4 = int_to_ptr.vmem [resolvable:$true] %s79_s4 }
  0x48   :  { %s1620_s21 = scalar_lea.hbm %s2234_s2, 64 }
  0x49   :  { %p1621_p4 = scmp.ne.s32.totalorder %s2234_s2, %s1620_s21  ;;  %p1624_p5 = scmp.lt.u32.totalorder %s1620_s21, %s2234_s2 }
  0x4b   :  { %p1626_p6 = pnand %p1624_p5, %p1621_p4 }
  0x4d   :  { %1629 = shalt.err (!%p1626_p6)
}
  0x4e   :  { %s1630_s0 = scalar_lea.vmem %s53_s18, 64  ;;  %p1635_p8 = scmp.lt.s32.totalorder %s53_s18, %s53_s18 }
  0x4f   :  { %p1631_p7 = scmp.ne.s32.totalorder %s53_s18, %s1630_s0  ;;  %p1636_p9 = scmp.lt.s32.totalorder %s1630_s0, %s1630_s0 }
  0x51   :  { %p1637_p10 = por %p1636_p9, %p1635_p8 }
  0x53   :  { %p1638_p11 = pnand %p1637_p10, %p1631_p7 }
  0x55   :  { %1641 = shalt.err (!%p1638_p11)
}
  0x56   :  { %55 = dma.hbm_to_vmem [thread:$0]  %s2234_s2, 64, %s53_s18, [#allocation6]  }
  0x57   :  { %s1642_s8 = scalar_lea.hbm %s2239_s7, 1024 }
  0x58   :  { %p1643_p12 = scmp.ne.s32.totalorder %s2239_s7, %s1642_s8  ;;  %p1646_p13 = scmp.lt.u32.totalorder %s1642_s8, %s2239_s7 }
  0x5a   :  { %p1648_p0 = pnand %p1646_p13, %p1643_p12 }
  0x5c   :  { %1651 = shalt.err (!%p1648_p0)
}
  0x5d   :  { %s1652_s20 = scalar_lea.vmem %s1915_s4, 1024  ;;  %p1657_p2 = scmp.lt.s32.totalorder %s1915_s4, %s1915_s4 }
  0x5e   :  { %p1653_p1 = scmp.ne.s32.totalorder %s1915_s4, %s1652_s20  ;;  %p1658_p3 = scmp.lt.s32.totalorder %s1652_s20, %s1652_s20 }
  0x60   :  { %p1659_p4 = por %p1658_p3, %p1657_p2 }
  0x62   :  { %p1660_p5 = pnand %p1659_p4, %p1653_p1 }
  0x64   :  { %1663 = shalt.err (!%p1660_p5)
}
  0x65   :  { %85 = dma.hbm_to_vmem [thread:$0]  %s2239_s7, 1024, %s1915_s4, [#allocation9], %s1766_s1, %s1766_s1, %s1767_s30  }
  0x66   :  { %s1772_s21 = smov [#allocation13]   ;;  %s1664_s27 = scalar_lea.hbm %s2242_s10, 1024 }
  0x67   :  { %s105_s22 = sshll.u32 %s1772_s21, 4  ;;  %p1665_p6 = scmp.ne.s32.totalorder %s2242_s10, %s1664_s27  ;;  %s106_s22 = int_to_ptr.vmem [resolvable:$true] %s105_s22 }
  0x68   :  { %p1668_p7 = scmp.lt.u32.totalorder %s1664_s27, %s2242_s10 }
  0x6a   :  { %p1670_p8 = pnand %p1668_p7, %p1665_p6 }
  0x6c   :  { %1673 = shalt.err (!%p1670_p8)
}
  0x6d   :  { %s1674_s15 = scalar_lea.vmem %s106_s22, 1024  ;;  %p1679_p10 = scmp.lt.s32.totalorder %s106_s22, %s106_s22 }
  0x6e   :  { %p1675_p9 = scmp.ne.s32.totalorder %s106_s22, %s1674_s15  ;;  %p1680_p11 = scmp.lt.s32.totalorder %s1674_s15, %s1674_s15 }
  0x70   :  { %p1681_p12 = por %p1680_p11, %p1679_p10 }
  0x72   :  { %p1682_p13 = pnand %p1681_p12, %p1675_p9 }
  0x74   :  { %1685 = shalt.err (!%p1682_p13)
}
  0x75   :  { %111 = dma.hbm_to_vmem [thread:$0]  %s2242_s10, 1024, %s106_s22, [#allocation12], %s1766_s1, %s1766_s1, %s1767_s30  }
  0x76   :  { %1752 = dma.done.wait [#allocation3], 128  }
  0x77   :  { %1753 = vsyncadd [#allocation3], 4294967168 }
  0x78   :  { %1754 = dma.done.wait [#allocation6], 192  }
  0x79   :  { %1755 = vsyncadd [#allocation6], 4294967104 }
  0x7a   :  { %1756 = dma.done.wait [#allocation9], 2048  }
  0x7b   :  { %1757 = vsyncadd [#allocation9], 4294965248 }
  0x7c   :  { %1758 = dma.done.wait [#allocation12], 2048  }
  0x7d   :  { %1759 = vsyncadd [#allocation12], 4294965248  ;;  %v137_v0 = vlaneseq  ;;  %v136_v4 = vld [vmem:[#allocation2] sm:$0xff]  ;;  %v1458_v7 = vld [vmem:[#allocation8] sm:$0xff]   ;;  %v1773_v32 = vmov 1.0|1.0  }
  0x7e   :  { %v1459_v8 = vld [vmem:[#allocation8 + $0x8] sm:$0xff]   ;;  %1351 = vmatprep.subr.bf16.mxu0 %v1458_v7  ;;  %v1460_v13 = vld [vmem:[#allocation8 + $0x10] sm:$0xff]   ;;  %v1461_v17 = vld [vmem:[#allocation8 + $0x18] sm:$0xff]   ;;  %s1776_s19 = smov [#allocation14]   ;;  %s1777_s20 = smov [#allocation15]  }
  0x7f   :  { %v1964_v1 = vshrl.u32 %v137_v0, 7  ;;  %1352 = vmatpush3.bf16.msra.mxu0 %v1458_v7  ;;  %v1462_v19 = vld [vmem:[#allocation8 + $0x20] sm:$0xff]   ;;  %v1463_v21 = vld [vmem:[#allocation8 + $0x28] sm:$0xff]   ;;  %v1464_v23 = vld [vmem:[#allocation8 + $0x30] sm:$0xff]   ;;  %v1990_v29 = vand.u32 127, %v137_v0  ;;  %s1201_s16 = sshll.u32 %s1776_s19, 4  ;;  %s1202_s16 = int_to_ptr.vmem [resolvable:$true] %s1201_s16 }
  0x80   :  { %1353 = vmatprep.subr.bf16.mxu0 %v1459_v8  ;;  %v1465_v25 = vld [vmem:[#allocation8 + $0x38] sm:$0xff]   ;;  %v2011_v45 = vld [vmem:[%s2237_s5] ss:$0 sm:$0xff]  ;;  %s1211_s2 = sshll.u32 %s1777_s20, 4  ;;  %s1778_s18 = smov [#allocation17]   ;;  %s1212_s2 = int_to_ptr.vmem [resolvable:$true] %s1211_s2 }
  0x81   :  { %v152_v2 = vsub.s32 1, %v1964_v1  ;;  %v141_v3 = vsub.s32 0, %v1964_v1  ;;  %v163_v9 = vsub.s32 2, %v1964_v1  ;;  %v174_v10 = vsub.s32 3, %v1964_v1  ;;  %v2023_v61 = vld [vmem:[%s2238_s6] ss:$0 sm:$0xff]  ;;  %p1691_p1 = scmp.lt.s32.totalorder %s1202_s16, %s1202_s16 }
  0x82   :  { %v185_v11 = vsub.s32 4, %v1964_v1  ;;  %v196_v12 = vsub.s32 5, %v1964_v1  ;;  %v207_v15 = vsub.s32 6, %v1964_v1  ;;  %v218_v16 = vsub.s32 7, %v1964_v1  ;;  %s1221_s21 = sshll.u32 %s1778_s18, 4  ;;  %s1222_s21 = int_to_ptr.vmem [resolvable:$true] %s1221_s21 }
  0x83   :  { %v153_v5 = vrot.slane %v136_v4, %v152_v2  ;;  %v142_v6 = vrot.slane %v136_v4, %v141_v3  ;;  %v164_v14 = vrot.slane %v136_v4, %v163_v9  ;;  %1354 = vmatpush3.bf16.msra.mxu0 %v1459_v8  ;;  %v175_v18 = vrot.slane %v136_v4, %v174_v10 }
  0x84   :  { %1355 = vmatprep.subr.bf16.mxu0 %v1460_v13  ;;  %v186_v20 = vrot.slane %v136_v4, %v185_v11  ;;  %v197_v22 = vrot.slane %v136_v4, %v196_v12  ;;  %v208_v24 = vrot.slane %v136_v4, %v207_v15  ;;  %v219_v26 = vrot.slane %v136_v4, %v218_v16 }
  0x85   :  { %155 = vbcast.lane.b32.xlu1 %v153_v5, 256  ;;  %144 = vbcast.lane.b32.xlu0 %v142_v6, 256 }
  0x87   :  { %1356 = vmatpush3.bf16.msra.mxu0 %v1460_v13 }
  0x88   :  { %1357 = vmatprep.subr.bf16.mxu0 %v1461_v17 }
  0x89   :  { %159 = vbcast.lane.b32.xlu1 %v153_v5, 264  ;;  %148 = vbcast.lane.b32.xlu0 %v142_v6, 264 }
  0x8b   :  { %1358 = vmatpush3.bf16.msra.mxu0 %v1461_v17 }
  0x8c   :  { %1359 = vmatprep.subr.bf16.mxu0 %v1462_v19 }
  0x8d   :  { %170 = vbcast.lane.b32.xlu1 %v164_v14, 264  ;;  %166 = vbcast.lane.b32.xlu0 %v164_v14, 256 }
  0x8f   :  { %1360 = vmatpush3.bf16.msra.mxu0 %v1462_v19 }
  0x90   :  { %1361 = vmatprep.subr.bf16.mxu0 %v1463_v21 }
  0x91   :  { %181 = vbcast.lane.b32.xlu1 %v175_v18, 264  ;;  %177 = vbcast.lane.b32.xlu0 %v175_v18, 256 }
  0x93   :  { %1362 = vmatpush3.bf16.msra.mxu0 %v1463_v21 }
  0x94   :  { %1363 = vmatprep.subr.bf16.mxu0 %v1464_v23 }
  0x95   :  { %192 = vbcast.lane.b32.xlu1 %v186_v20, 264  ;;  %188 = vbcast.lane.b32.xlu0 %v186_v20, 256 }
  0x97   :  { %1364 = vmatpush3.bf16.msra.mxu0 %v1464_v23 }
  0x98   :  { %1365 = vmatprep.subr.bf16.mxu0 %v1465_v25 }
  0x99   :  { %203 = vbcast.lane.b32.xlu1 %v197_v22, 264  ;;  %199 = vbcast.lane.b32.xlu0 %v197_v22, 256 }
  0x9b   :  { %1366 = vmatpush3.bf16.msra.mxu0 %v1465_v25 }
  0x9d   :  { %214 = vbcast.lane.b32.xlu1 %v208_v24, 264  ;;  %210 = vbcast.lane.b32.xlu0 %v208_v24, 256 }
  0xa1   :  { %225 = vbcast.lane.b32.xlu1 %v219_v26, 264  ;;  %221 = vbcast.lane.b32.xlu0 %v219_v26, 256 }
  0xf7   :  { %v156_v27 = vpop.permute.xlu1 %155  ;;  %v145_v28 = vpop.permute.xlu0 %144 }
  0xf8   :  { %vm229_vm0 = vcmp.eq.s32.totalorder %v1990_v29, %v156_v27  ;;  %vm227_vm3 = vcmp.eq.s32.totalorder %v1990_v29, %v145_v28 }
  0xfb   :  { %v160_v30 = vpop.permute.xlu1 %159  ;;  %v149_v31 = vpop.permute.xlu0 %148 }
  0xfc   :  { %vm230_vm1 = vcmp.eq.s32.totalorder %v1990_v29, %v160_v30  ;;  %vm228_vm2 = vcmp.eq.s32.totalorder %v1990_v29, %v149_v31 }
  0xfd   :  { %vm1267_vm4 = vmpackc.low %vm230_vm1, %vm229_vm0 }
  0xfe   :  { %vm1265_vm5 = vmpackc.low %vm228_vm2, %vm227_vm3 }
  0xff   :  { %1367 = vmatprep.mubr.msk.bf16.mxu0 %vm1265_vm5, %v1773_v32  ;;  %v171_v33 = vpop.permute.xlu1 %170  ;;  %v167_v34 = vpop.permute.xlu0 %166 }
 0x100   :  { %1368 = vmatmul.mubr.msk.bf16.vlgmr.msra.gmra.mrb[0].mxu0 %vm1267_vm4, %v1773_v32  ;;  %vm232_vm6 = vcmp.eq.s32.totalorder %v1990_v29, %v171_v33  ;;  %vm231_vm7 = vcmp.eq.s32.totalorder %v1990_v29, %v167_v34 }
 0x101   :  { %vm1269_vm8 = vmpackc.low %vm232_vm6, %vm231_vm7 }
 0x102   :  { %1371 = vmatprep.mubr.msk.bf16.mxu0 %vm1269_vm8, %v1773_v32  ;;  %vm549_vm8 = vcmask 130112  }
 0x103   :  { %v182_v35 = vpop.permute.xlu1 %181  ;;  %v178_v36 = vpop.permute.xlu0 %177 }
 0x104   :  { %vm234_vm9 = vcmp.eq.s32.totalorder %v1990_v29, %v182_v35  ;;  %vm233_vm10 = vcmp.eq.s32.totalorder %v1990_v29, %v178_v36 }
 0x105   :  { %vm1271_vm11 = vmpackc.low %vm234_vm9, %vm233_vm10  ;;  %vm614_vm9 = vcmask 1041409   ;;  %vm616_vm10 = vcmask 1042434  }
 0x107   :  { %v193_v37 = vpop.permute.xlu1 %192  ;;  %v189_v38 = vpop.permute.xlu0 %188 }
 0x108   :  { %1372 = vmatmul.mubr.msk.bf16.gmra.mrb[4].mxu0 %vm1271_vm11, %v1773_v32  ;;  %vm236_vm12 = vcmp.eq.s32.totalorder %v1990_v29, %v193_v37  ;;  %vm235_vm13 = vcmp.eq.s32.totalorder %v1990_v29, %v189_v38  ;;  %vm618_vm11 = vcmask 1043459  }
 0x109   :  { %vm1273_vm14 = vmpackc.low %vm236_vm12, %vm235_vm13  ;;  %vm620_vm12 = vcmask 1044484   ;;  %vm622_vm13 = vcmask 1045509  }
 0x10a   :  { %1375 = vmatprep.mubr.msk.bf16.mxu0 %vm1273_vm14, %v1773_v32  ;;  %vm624_vm14 = vcmask 1046534  }
 0x10b   :  { %v204_v39 = vpop.permute.xlu1 %203  ;;  %v200_v40 = vpop.permute.xlu0 %199 }
 0x10c   :  { %vm238_vm15 = vcmp.eq.s32.totalorder %v1990_v29, %v204_v39  ;;  %vm237_vm0 = vcmp.eq.s32.totalorder %v1990_v29, %v200_v40 }
 0x10d   :  { %vm1275_vm1 = vmpackc.low %vm238_vm15, %vm237_vm0  ;;  %vm626_vm15 = vcmask 1047559  }
 0x10f   :  { %v215_v41 = vpop.permute.xlu1 %214  ;;  %v211_v42 = vpop.permute.xlu0 %210 }
 0x110   :  { %1376 = vmatmul.mubr.msk.bf16.gmra.mrb[8].mxu0 %vm1275_vm1, %v1773_v32  ;;  %vm240_vm2 = vcmp.eq.s32.totalorder %v1990_v29, %v215_v41  ;;  %vm239_vm3 = vcmp.eq.s32.totalorder %v1990_v29, %v211_v42  ;;  %vm630_vm1 = vcmask 130048  }
 0x111   :  { %vm1277_vm4 = vmpackc.low %vm240_vm2, %vm239_vm3  ;;  %vm1775_vm2 = vmmov 0   ;;  %vm1168_vm3 = vcmp.lt.s32.totalorder %v1990_v29, 8 }
 0x112   :  { %1379 = vmatprep.mubr.msk.bf16.mxu0 %vm1277_vm4, %v1773_v32 }
 0x113   :  { %v226_v43 = vpop.permute.xlu1 %225  ;;  %v222_v44 = vpop.permute.xlu0 %221 }
 0x114   :  { %vm242_vm5 = vcmp.eq.s32.totalorder %v1990_v29, %v226_v43  ;;  %vm241_vm6 = vcmp.eq.s32.totalorder %v1990_v29, %v222_v44 }
 0x115   :  { %vm1279_vm7 = vmpackc.low %vm242_vm5, %vm241_vm6 }
 0x118   :  { %1380 = vmatmul.mubr.msk.bf16.gmra.mrb[12].mxu0 %vm1279_vm7, %v1773_v32 }
 0x1d3   :  { %v1369_v46 = vpop.f32.mrb[0].mxu0 }
 0x1d4   :  { %v397_v47 = vadd.f32 %v1369_v46, %v2011_v45  ;;  %v388_v48 = vpop.f32.mrb[1].mxu0 }
 0x1d5   :  { %v389_v49 = vadd.f32 %v2011_v45, %v388_v48  ;;  %v1370_v50 = vpop.f32.mrb[2].mxu0 }
 0x1d6   :  { %1490 = vtanh.f32 %v397_v47  ;;  %v391_v51 = vpop.f32.mrb[3].mxu0  ;;  %v400_v53 = vadd.f32 %v1370_v50, %v2011_v45 }
 0x1d7   :  { %v392_v52 = vadd.f32 %v2011_v45, %v391_v51  ;;  %1492 = vtanh.f32 %v389_v49 }
 0x1d9   :  { %1494 = vtanh.f32 %v392_v52 }
 0x1da   :  { %1496 = vtanh.f32 %v400_v53 }
 0x1db   :  { %v1373_v54 = vpop.f32.mrb[4].mxu0 }
 0x1dc   :  { %v413_v55 = vadd.f32 %v1373_v54, %v2011_v45  ;;  %v404_v56 = vpop.f32.mrb[5].mxu0 }
 0x1dd   :  { %v405_v57 = vadd.f32 %v2011_v45, %v404_v56  ;;  %v1374_v58 = vpop.f32.mrb[6].mxu0 }
 0x1de   :  { %1498 = vtanh.f32 %v413_v55  ;;  %v416_v59 = vadd.f32 %v1374_v58, %v2011_v45  ;;  %v407_v60 = vpop.f32.mrb[7].mxu0 }
 0x1df   :  { %1500 = vtanh.f32 %v405_v57  ;;  %v408_v63 = vadd.f32 %v2011_v45, %v407_v60 }
 0x1e0   :  { %v2025_v62 = vpop.eup %1490  ;;  %1502 = vtanh.f32 %v416_v59 }
 0x1e1   :  { %v476_v0 = vmul.f32 %v2025_v62, %v2023_v61  ;;  %v2030_v4 = vpop.eup %1492  ;;  %1504 = vtanh.f32 %v408_v63 }
 0x1e2   :  { %v474_v18 = vmul.f32 %v2030_v4, %v2023_v61 }
 0x1e3   :  { %v2032_v5 = vpop.eup %1494  ;;  %494 = vadd.xlane.f32.xlu0 %v476_v0  ;;  %v1377_v6 = vpop.f32.mrb[8].mxu0 }
 0x1e4   :  { %v429_v7 = vadd.f32 %v1377_v6, %v2011_v45  ;;  %v420_v8 = vpop.f32.mrb[9].mxu0  ;;  %v475_v13 = vmul.f32 %v2032_v5, %v2023_v61  ;;  %v2040_v19 = vpop.eup %1496 }
 0x1e5   :  { %v421_v14 = vadd.f32 %v2011_v45, %v420_v8  ;;  %v1378_v17 = vpop.f32.mrb[10].mxu0  ;;  %v477_v25 = vmul.f32 %v2040_v19, %v2023_v61 }
 0x1e6   :  { %1506 = vtanh.f32 %v429_v7  ;;  %v432_v20 = vadd.f32 %v1378_v17, %v2011_v45  ;;  %492 = vadd.xlane.f32.xlu1 %v475_v13  ;;  %v423_v21 = vpop.f32.mrb[11].mxu0  ;;  %v544_v7 = vadd.s32 4294967288, %v1990_v29 }
 0x1e7   :  { %1508 = vtanh.f32 %v421_v14  ;;  %490 = vadd.xlane.f32.xlu0 %v474_v18  ;;  %v424_v23 = vadd.f32 %v2011_v45, %v423_v21  ;;  %v542_v14 = vsub.s32 %v1990_v29, %v1964_v1  ;;  %v1184_v29 = vld [vmem:[%s2235_s3] sm:$0xff]  ;;  %s1686_s3 = scalar_lea.vmem %s1202_s16, 128 }
 0x1e8   :  { %v2043_v22 = vpop.eup %1498  ;;  %1510 = vtanh.f32 %v432_v20  ;;  %v547_v17 = vsub.s32 %v544_v7, %v1964_v1  ;;  %v1477_v1 = vld [vmem:[#allocation10 + $0x28] sm:$0xff]   ;;  %p1687_p0 = scmp.ne.s32.totalorder %s1202_s16, %s1686_s3  ;;  %p1692_p2 = scmp.lt.s32.totalorder %s1686_s3, %s1686_s3 }
 0x1e9   :  { %v2046_v24 = vpop.eup %1500  ;;  %v480_v26 = vmul.f32 %v2043_v22, %v2023_v61  ;;  %1512 = vtanh.f32 %v424_v23 }
 0x1ea   :  { %v2052_v27 = vpop.eup %1502  ;;  %v478_v35 = vmul.f32 %v2046_v24, %v2023_v61  ;;  %p1693_p3 = por %p1692_p2, %p1691_p1 }
 0x1eb   :  { %496 = vadd.xlane.f32.xlu0 %v477_v25  ;;  %502 = vadd.xlane.f32.xlu1 %v480_v26  ;;  %v1381_v28 = vpop.f32.mrb[12].mxu0  ;;  %v481_v34 = vmul.f32 %v2052_v27, %v2023_v61  ;;  %v2060_v36 = vpop.eup %1504 }
 0x1ec   :  { %v445_v30 = vadd.f32 %v1381_v28, %v2011_v45  ;;  %v436_v31 = vpop.f32.mrb[13].mxu0  ;;  %v479_v42 = vmul.f32 %v2060_v36, %v2023_v61  ;;  %p1694_p4 = pnand %p1693_p3, %p1687_p0 }
 0x1ed   :  { %v437_v32 = vadd.f32 %v2011_v45, %v436_v31  ;;  %v1382_v33 = vpop.f32.mrb[14].mxu0 }
 0x1ee   :  { %v439_v37 = vpop.f32.mrb[15].mxu0  ;;  %v448_v40 = vadd.f32 %v1382_v33, %v2011_v45 }
 0x1ef   :  { %1514 = vtanh.f32 %v437_v32  ;;  %v440_v38 = vadd.f32 %v2011_v45, %v439_v37  ;;  %504 = vadd.xlane.f32.xlu0 %v481_v34  ;;  %498 = vadd.xlane.f32.xlu1 %v478_v35 }
 0x1f0   :  { %v2063_v39 = vpop.eup %1506  ;;  %1516 = vtanh.f32 %v445_v30 }
 0x1f1   :  { %v2066_v41 = vpop.eup %1508  ;;  %1518 = vtanh.f32 %v440_v38  ;;  %v484_v43 = vmul.f32 %v2063_v39, %v2023_v61 }
 0x1f2   :  { %v2072_v44 = vpop.eup %1510  ;;  %1520 = vtanh.f32 %v448_v40  ;;  %v482_v45 = vmul.f32 %v2066_v41, %v2023_v61 }
 0x1f3   :  { %500 = vadd.xlane.f32.xlu0 %v479_v42  ;;  %510 = vadd.xlane.f32.xlu1 %v484_v43  ;;  %v485_v46 = vmul.f32 %v2072_v44, %v2023_v61  ;;  %v2078_v47 = vpop.eup %1512 }
 0x1f4   :  { %v483_v49 = vmul.f32 %v2078_v47, %v2023_v61 }
 0x1f7   :  { %512 = vadd.xlane.f32.xlu0 %v485_v46  ;;  %506 = vadd.xlane.f32.xlu1 %v482_v45 }
 0x1f9   :  { %v2080_v48 = vpop.eup %1514 }
 0x1fa   :  { %v2084_v50 = vpop.eup %1516  ;;  %v486_v51 = vmul.f32 %v2080_v48, %v2023_v61 }
 0x1fb   :  { %v2088_v52 = vpop.eup %1518  ;;  %508 = vadd.xlane.f32.xlu0 %v483_v49  ;;  %v488_v55 = vmul.f32 %v2084_v50, %v2023_v61 }
 0x1fc   :  { %514 = vadd.xlane.f32.xlu1 %v486_v51  ;;  %v487_v53 = vmul.f32 %v2088_v52, %v2023_v61  ;;  %v2092_v54 = vpop.eup %1520 }
 0x1fd   :  { %v489_v56 = vmul.f32 %v2092_v54, %v2023_v61 }
 0x1ff   :  { %516 = vadd.xlane.f32.xlu0 %v487_v53 }
 0x200   :  { %518 = vadd.xlane.f32.xlu1 %v488_v55 }
 0x203   :  { %520 = vadd.xlane.f32.xlu0 %v489_v56 }
 0x270   :  { %v495_v57 = vpop.xlane.xlu0 %494 }
 0x271   :  { %v554_v23 = vrot.slane %v495_v57, %v542_v14 }
 0x273   :  { %v493_v58 = vpop.xlane.xlu1 %492 }
 0x274   :  { %v491_v59 = vpop.xlane.xlu0 %490  ;;  %v548_v25 = vrot.slane %v493_v58, %v547_v17 }
 0x275   :  { %v543_v26 = vrot.slane %v491_v59, %v542_v14 }
 0x277   :  { %v550_v33 = vsel %vm549_vm8, %v548_v25, %v543_v26 }
 0x278   :  { %v503_v60 = vpop.xlane.xlu1 %502  ;;  %v497_v63 = vpop.xlane.xlu0 %496 }
 0x279   :  { %v558_v18 = vrot.slane %v497_v63, %v547_v17  ;;  %v572_v42 = vrot.slane %v503_v60, %v542_v14  ;;  %v522_v63 = vld [vmem:[#allocation5] sm:$0xff] }
 0x27a   :  { %vm523_vm0 = vcmp.gt.f32.partialorder %v522_v63, 0.0  ;;  %v829_v63 = vld [vmem:[#allocation7] sm:$0xf] }
 0x27b   :  { %v559_v30 = vsel %vm549_vm8, %v558_v18, %v554_v23 }
 0x27c   :  { %v499_v0 = vpop.xlane.xlu1 %498  ;;  %v505_v6 = vpop.xlane.xlu0 %504  ;;  %v615_v38 = vsel %vm614_vm9, %v559_v30, %v550_v33 }
 0x27d   :  { %v563_v28 = vrot.slane %v499_v0, %v542_v14  ;;  %v576_v34 = vrot.slane %v505_v6, %v547_v17 }
 0x27f   :  { %v577_v49 = vsel %vm549_vm8, %v576_v34, %v572_v42  ;;  %v1466_v42 = vld [vmem:[#allocation11] sm:$0xff]  }
 0x280   :  { %v511_v8 = vpop.xlane.xlu1 %510  ;;  %v501_v13 = vpop.xlane.xlu0 %500 }
 0x281   :  { %v567_v20 = vrot.slane %v501_v13, %v547_v17  ;;  %v590_v58 = vrot.slane %v511_v8, %v542_v14 }
 0x283   :  { %v568_v31 = vsel %vm549_vm8, %v567_v20, %v563_v28 }
 0x284   :  { %v507_v61 = vpop.xlane.xlu1 %506  ;;  %v513_v21 = vpop.xlane.xlu0 %512  ;;  %v617_v43 = vsel %vm616_vm10, %v568_v31, %v615_v38 }
 0x285   :  { %v581_v40 = vrot.slane %v507_v61, %v542_v14  ;;  %v594_v51 = vrot.slane %v513_v21, %v547_v17  ;;  %v619_v55 = vsel %vm618_vm11, %v577_v49, %v617_v43  ;;  %v1774_v43 = vmov 0.0   ;;  %v1471_v49 = vld [vmem:[#allocation10 + $0x10] sm:$0xff]  }
 0x286   :  { %1383 = vmatprep.subr.bf16.mxu1 %v1774_v43  ;;  %1403 = vmatprep.subr.bf16.mxu0 %v1774_v43 }
 0x287   :  { %v595_v6 = vsel %vm549_vm8, %v594_v51, %v590_v58  ;;  %1384 = vmatpush3.bf16.msra.mxu1 %v1466_v42  ;;  %v1480_v58 = vld [vmem:[#allocation11 + $0x38] sm:$0xff]   ;;  %1399 = vmatprep.mubr.msk.bf16.mxu1 %vm1775_vm2, %v1774_v43 }
 0x288   :  { %v509_v32 = vpop.xlane.xlu0 %508  ;;  %1385 = vmatprep.subr.bf16.mxu1 %v1774_v43  ;;  %1419 = vmatprep.mubr.msk.bf16.mxu0 %vm1775_vm2, %v1774_v43 }
 0x289   :  { %v585_v35 = vrot.slane %v509_v32, %v547_v17  ;;  %v515_v37 = vpop.xlane.xlu1 %514 }
 0x28a   :  { %v599_v56 = vrot.slane %v515_v37, %v542_v14 }
 0x28b   :  { %v586_v46 = vsel %vm549_vm8, %v585_v35, %v581_v40 }
 0x28c   :  { %v517_v45 = vpop.xlane.xlu0 %516  ;;  %v621_v59 = vsel %vm620_vm12, %v586_v46, %v619_v55  ;;  %v1469_v46 = vld [vmem:[#allocation10 + $0x8] sm:$0xff]   ;;  %v1475_v55 = vld [vmem:[#allocation10 + $0x20] sm:$0xff]  }
 0x28d   :  { %v603_v53 = vrot.slane %v517_v45, %v547_v17  ;;  %v519_v57 = vpop.xlane.xlu1 %518  ;;  %v623_v18 = vsel %vm622_vm13, %v595_v6, %v621_v59  ;;  %v1470_v45 = vld [vmem:[#allocation11 + $0x10] sm:$0xff]   ;;  %v1481_v59 = vld [vmem:[#allocation10 + $0x38] sm:$0xff]  }
 0x28e   :  { %v608_v7 = vrot.slane %v519_v57, %v542_v14  ;;  %v1479_v57 = vld [vmem:[#allocation10 + $0x30] sm:$0xff]  }
 0x28f   :  { %v604_v60 = vsel %vm549_vm8, %v603_v53, %v599_v56  ;;  %v1473_v53 = vld [vmem:[#allocation10 + $0x18] sm:$0xff]   ;;  %v1476_v56 = vld [vmem:[#allocation11 + $0x28] sm:$0xff]   ;;  %v1484_v6 = vld [vmem:[#allocation13 + $0x10] sm:$0xff]  }
 0x290   :  { %v521_v0 = vpop.xlane.xlu0 %520  ;;  %v625_v8 = vsel %vm624_vm14, %v604_v60, %v623_v18  ;;  %v1482_v60 = vld [vmem:[#allocation13] sm:$0xff]  }
 0x291   :  { %v612_v13 = vrot.slane %v521_v0, %v547_v17  ;;  %v1483_v0 = vld [vmem:[#allocation13 + $0x8] sm:$0xff]  }
 0x293   :  { %v613_v20 = vsel %vm549_vm8, %v612_v13, %v608_v7  ;;  %v1485_v7 = vld [vmem:[#allocation13 + $0x18] sm:$0xff]   ;;  %v1486_v13 = vld [vmem:[#allocation13 + $0x20] sm:$0xff]  }
 0x294   :  { %v627_v61 = vsel %vm626_vm15, %v613_v20, %v625_v8 }
 0x295   :  { %v629_v21 = vsel %vm523_vm0, %v627_v61, -1e+09 }
 0x296   :  { %v631_v23 = vsel %vm630_vm1, %v629_v21, -inf }
 0x297   :  { %632 = vmax.xlane.f32.xlu1 %v631_v23 }
 0x324   :  { %v633_v25 = vpop.xlane.xlu1 %632 }
 0x325   :  { %v634_v26 = vsub.f32 %v629_v21, %v633_v25 }
 0x327   :  { %v635_v28 = vmul.f32 1.442695, %v634_v26 }
 0x329   :  { %1522 = vpow2.f32 %v635_v28 }
 0x333   :  { %v1523_v14 = vpop.eup %1522 }
 0x334   :  { %v637_v17 = vsel %vm523_vm0, %v1523_v14, 0.0 }
 0x335   :  { %v638_v30 = vsel %vm630_vm1, %v637_v17, 0.0 }
 0x336   :  { %639 = vadd.xlane.f32.xlu0 %v638_v30  ;;  %v1487_v30 = vld [vmem:[#allocation13 + $0x28] sm:$0xff]  }
 0x3c3   :  { %v640_v31 = vpop.xlane.xlu0 %639 }
 0x3c4   :  { %v641_v32 = vmax.f32 %v640_v31, 1e-20 }
 0x3c6   :  { %1524 = vrcp.f32 %v641_v32 }
 0x3d0   :  { %v1525_v33 = vpop.eup %1524 }
 0x3d1   :  { %v643_v34 = vmul.f32 %v1525_v33, %v637_v17 }
 0x3d3   :  { %644 = vst.msk [vmem:[#allocation17] sm:$0xff] %vm630_vm1, %v643_v34  ;;  %v648_v35 = vrot.slane %v643_v34, %v141_v3  ;;  %v670_v37 = vrot.slane %v643_v34, %v163_v9  ;;  %v659_v38 = vrot.slane %v643_v34, %v152_v2  ;;  %v681_v40 = vrot.slane %v643_v34, %v174_v10  ;;  %v1467_v9 = vld [vmem:[#allocation10] sm:$0xff]   ;;  %v1468_v2 = vld [vmem:[#allocation11 + $0x8] sm:$0xff]  }
 0x3d4   :  { %v692_v3 = vrot.slane %v643_v34, %v185_v11  ;;  %1404 = vmatpush3.bf16.msra.mxu0 %v1467_v9  ;;  %v703_v10 = vrot.slane %v643_v34, %v196_v12  ;;  %1386 = vmatpush3.bf16.msra.mxu1 %v1468_v2  ;;  %v714_v11 = vrot.slane %v643_v34, %v207_v15  ;;  %v1472_v12 = vld [vmem:[#allocation11 + $0x18] sm:$0xff]   ;;  %v1474_v15 = vld [vmem:[#allocation11 + $0x20] sm:$0xff]  }
 0x3d5   :  { %654 = vbcast.lane.b32.xlu0 %v648_v35, 264  ;;  %650 = vbcast.lane.b32.xlu1 %v648_v35, 256  ;;  %v725_v51 = vrot.slane %v643_v34, %v218_v16  ;;  %v1478_v16 = vld [vmem:[#allocation11 + $0x30] sm:$0xff]  }
 0x3d6   :  { %1405 = vmatprep.subr.bf16.mxu0 %v1774_v43  ;;  %1387 = vmatprep.subr.bf16.mxu1 %v1774_v43 }
 0x3d8   :  { %1406 = vmatpush3.bf16.msra.mxu0 %v1469_v46  ;;  %1388 = vmatpush3.bf16.msra.mxu1 %v1470_v45 }
 0x3d9   :  { %672 = vbcast.lane.b32.xlu0 %v670_v37, 256  ;;  %661 = vbcast.lane.b32.xlu1 %v659_v38, 256 }
 0x3da   :  { %1407 = vmatprep.subr.bf16.mxu0 %v1774_v43  ;;  %1389 = vmatprep.subr.bf16.mxu1 %v1774_v43 }
 0x3dc   :  { %1408 = vmatpush3.bf16.msra.mxu0 %v1471_v49  ;;  %1390 = vmatpush3.bf16.msra.mxu1 %v1472_v12 }
 0x3dd   :  { %683 = vbcast.lane.b32.xlu0 %v681_v40, 256  ;;  %665 = vbcast.lane.b32.xlu1 %v659_v38, 264 }
 0x3de   :  { %1409 = vmatprep.subr.bf16.mxu0 %v1774_v43  ;;  %1391 = vmatprep.subr.bf16.mxu1 %v1774_v43 }
 0x3e0   :  { %1410 = vmatpush3.bf16.msra.mxu0 %v1473_v53  ;;  %1392 = vmatpush3.bf16.msra.mxu1 %v1474_v15 }
 0x3e1   :  { %694 = vbcast.lane.b32.xlu0 %v692_v3, 256  ;;  %676 = vbcast.lane.b32.xlu1 %v670_v37, 264 }
 0x3e2   :  { %1411 = vmatprep.subr.bf16.mxu0 %v1774_v43  ;;  %1393 = vmatprep.subr.bf16.mxu1 %v1774_v43 }
 0x3e4   :  { %1412 = vmatpush3.bf16.msra.mxu0 %v1475_v55  ;;  %1394 = vmatpush3.bf16.msra.mxu1 %v1476_v56 }
 0x3e5   :  { %705 = vbcast.lane.b32.xlu0 %v703_v10, 256  ;;  %687 = vbcast.lane.b32.xlu1 %v681_v40, 264 }
 0x3e6   :  { %1413 = vmatprep.subr.bf16.mxu0 %v1774_v43  ;;  %1395 = vmatprep.subr.bf16.mxu1 %v1774_v43 }
 0x3e8   :  { %1414 = vmatpush3.bf16.msra.mxu0 %v1477_v1  ;;  %1396 = vmatpush3.bf16.msra.mxu1 %v1478_v16 }
 0x3e9   :  { %716 = vbcast.lane.b32.xlu0 %v714_v11, 256  ;;  %698 = vbcast.lane.b32.xlu1 %v692_v3, 264 }
 0x3ea   :  { %1415 = vmatprep.subr.bf16.mxu0 %v1774_v43  ;;  %1397 = vmatprep.subr.bf16.mxu1 %v1774_v43 }
 0x3ec   :  { %1416 = vmatpush3.bf16.msra.mxu0 %v1479_v57  ;;  %1398 = vmatpush3.bf16.msra.mxu1 %v1480_v58 }
 0x3ed   :  { %727 = vbcast.lane.b32.xlu0 %v725_v51, 256  ;;  %709 = vbcast.lane.b32.xlu1 %v703_v10, 264 }
 0x3ee   :  { %1417 = vmatprep.subr.bf16.mxu0 %v1774_v43  ;;  %1423 = vmatprep.subr.bf16.mxu1 %v1774_v43 }
 0x3ef   :  { %1400 = vmatmul.mubr.bf16.vlgmr.msra.gmra.mrb[0].mxu1 %v829_v63 }
 0x3f0   :  { %1418 = vmatpush3.bf16.msra.mxu0 %v1481_v59  ;;  %1439 = vmatprep.mubr.msk.bf16.mxu1 %vm1775_vm2, %v1774_v43 }
 0x3f1   :  { %720 = vbcast.lane.b32.xlu1 %v714_v11, 264  ;;  %1424 = vmatpush3.bf16.msra.mxu1 %v1482_v60 }
 0x3f2   :  { %1425 = vmatprep.subr.bf16.mxu1 %v1774_v43 }
 0x3f5   :  { %731 = vbcast.lane.b32.xlu1 %v725_v51, 264  ;;  %1426 = vmatpush3.bf16.msra.mxu1 %v1483_v0 }
 0x3f6   :  { %1427 = vmatprep.subr.bf16.mxu1 %v1774_v43 }
 0x3f9   :  { %1428 = vmatpush3.bf16.msra.mxu1 %v1484_v6 }
 0x3fa   :  { %1429 = vmatprep.subr.bf16.mxu1 %v1774_v43 }
 0x3fd   :  { %1430 = vmatpush3.bf16.msra.mxu1 %v1485_v7 }
 0x3fe   :  { %1431 = vmatprep.subr.bf16.mxu1 %v1774_v43 }
 0x401   :  { %1432 = vmatpush3.bf16.msra.mxu1 %v1486_v13 }
 0x402   :  { %1433 = vmatprep.subr.bf16.mxu1 %v1774_v43 }
 0x405   :  { %1434 = vmatpush3.bf16.msra.mxu1 %v1487_v30 }
 0x406   :  { %1435 = vmatprep.subr.bf16.mxu1 %v1774_v43 }
 0x447   :  { %v655_v18 = vpop.permute.xlu0 %654  ;;  %v651_v20 = vpop.permute.xlu1 %650 }
 0x448   :  { %v734_v21 = vmul.f32 %v2032_v5, %v655_v18  ;;  %v733_v23 = vmul.f32 %v2030_v4, %v651_v20 }
 0x44a   :  { %v749_v31 = vadd.f32 %v734_v21, %v733_v23 }
 0x44b   :  { %v673_v8 = vpop.permute.xlu0 %672  ;;  %v662_v61 = vpop.permute.xlu1 %661 }
 0x44c   :  { %v735_v28 = vmul.f32 %v2025_v62, %v662_v61  ;;  %v737_v34 = vmul.f32 %v2046_v24, %v673_v8  ;;  %v750_v37 = vrot.slane %v749_v31, 4 }
 0x44e   :  { %v751_v9 = vadd.f32 %v750_v37, %v749_v31 }
 0x44f   :  { %v684_v25 = vpop.permute.xlu0 %683  ;;  %v666_v26 = vpop.permute.xlu1 %665 }
 0x450   :  { %v736_v14 = vmul.f32 %v2040_v19, %v666_v26  ;;  %v739_v62 = vmul.f32 %v2043_v22, %v684_v25  ;;  %v752_v12 = vrot.slane %v751_v9, 2 }
 0x452   :  { %v756_v17 = vadd.f32 %v736_v14, %v735_v28  ;;  %v753_v58 = vadd.f32 %v752_v12, %v751_v9 }
 0x453   :  { %v695_v32 = vpop.permute.xlu0 %694  ;;  %v677_v33 = vpop.permute.xlu1 %676 }
 0x454   :  { %v738_v35 = vmul.f32 %v2060_v36, %v677_v33  ;;  %v757_v5 = vrot.slane %v756_v17, 4  ;;  %v741_v36 = vmul.f32 %v2066_v41, %v695_v32  ;;  %v754_v8 = vrot.slane %v753_v58, 1 }
 0x456   :  { %v763_v4 = vadd.f32 %v738_v35, %v737_v34  ;;  %v758_v3 = vadd.f32 %v757_v5, %v756_v17  ;;  %v755_v33 = vadd.f32 %v754_v8, %v753_v58 }
 0x457   :  { %v688_v38 = vpop.permute.xlu1 %687  ;;  %v706_v19 = vpop.permute.xlu0 %705 }
 0x458   :  { %v764_v40 = vrot.slane %v763_v4, 4  ;;  %v740_v42 = vmul.f32 %v2052_v27, %v688_v38  ;;  %v759_v11 = vrot.slane %v758_v3, 2  ;;  %v743_v27 = vmul.f32 %v2063_v39, %v706_v19 }
 0x45a   :  { %v765_v2 = vadd.f32 %v764_v40, %v763_v4  ;;  %v770_v10 = vadd.f32 %v740_v42, %v739_v62  ;;  %v760_v16 = vadd.f32 %v759_v11, %v758_v3  ;;  %v805_v42 = vpack.c.bf16 %v755_v33, %v755_v33 }
 0x45b   :  { %v699_v24 = vpop.permute.xlu1 %698  ;;  %v717_v15 = vpop.permute.xlu0 %716 }
 0x45c   :  { %v742_v46 = vmul.f32 %v2078_v47, %v699_v24  ;;  %v771_v45 = vrot.slane %v770_v10, 4  ;;  %v766_v51 = vrot.slane %v765_v2, 2  ;;  %v745_v60 = vmul.f32 %v2080_v48, %v717_v15 }
 0x45d   :  { %v761_v18 = vrot.slane %v760_v16, 1  ;;  %v942_v11 = vunpack.c.l.b16 %v805_v42 }
 0x45e   :  { %v777_v49 = vadd.f32 %v742_v46, %v741_v36  ;;  %v772_v53 = vadd.f32 %v771_v45, %v770_v10  ;;  %v767_v41 = vadd.f32 %v766_v51, %v765_v2 }
 0x45f   :  { %v710_v22 = vpop.permute.xlu1 %709  ;;  %v728_v7 = vpop.permute.xlu0 %727  ;;  %v762_v17 = vadd.f32 %v761_v18, %v760_v16  ;;  %v1489_v18 = vld [vmem:[#allocation13 + $0x38] sm:$0xff]  }
 0x460   :  { %v778_v55 = vrot.slane %v777_v49, 4  ;;  %v773_v56 = vrot.slane %v772_v53, 2  ;;  %v744_v1 = vmul.f32 %v2072_v44, %v710_v22  ;;  %v768_v61 = vrot.slane %v767_v41, 1 }
 0x461   :  { %v747_v25 = vmul.f32 %v2084_v50, %v728_v7  ;;  %v806_v38 = vpack.c.bf16 %v762_v17, %v762_v17  ;;  %v1488_v7 = vld [vmem:[#allocation13 + $0x30] sm:$0xff]  }
 0x462   :  { %v779_v57 = vadd.f32 %v778_v55, %v777_v49  ;;  %v784_v59 = vadd.f32 %v744_v1, %v743_v27  ;;  %v774_v63 = vadd.f32 %v773_v56, %v772_v53  ;;  %v769_v31 = vadd.f32 %v768_v61, %v767_v41  ;;  %1436 = vmatpush3.bf16.msra.mxu1 %v1488_v7 }
 0x463   :  { %v721_v47 = vpop.permute.xlu1 %720  ;;  %v943_v10 = vunpack.c.l.b16 %v806_v38  ;;  %1437 = vmatprep.subr.bf16.mxu1 %v1774_v43 }
 0x464   :  { %v780_v0 = vrot.slane %v779_v57, 2  ;;  %v746_v6 = vmul.f32 %v2088_v52, %v721_v47  ;;  %v785_v13 = vrot.slane %v784_v59, 4  ;;  %v775_v23 = vrot.slane %v774_v63, 1 }
 0x465   :  { %v807_v50 = vpack.c.bf16 %v769_v31, %v769_v31  ;;  %v950_v15 = vsel %vm614_vm9, %v943_v10, %v942_v11 }
 0x466   :  { %v781_v20 = vadd.f32 %v780_v0, %v779_v57  ;;  %v791_v39 = vadd.f32 %v746_v6, %v745_v60  ;;  %v786_v44 = vadd.f32 %v785_v13, %v784_v59  ;;  %v776_v34 = vadd.f32 %v775_v23, %v774_v63  ;;  %1438 = vmatpush3.bf16.msra.mxu1 %v1489_v18 }
 0x467   :  { %v732_v21 = vpop.permute.xlu1 %731  ;;  %v944_v45 = vunpack.c.l.b16 %v807_v50 }
 0x468   :  { %v792_v26 = vrot.slane %v791_v39, 4  ;;  %v748_v28 = vmul.f32 %v2092_v54, %v732_v21  ;;  %v782_v14 = vrot.slane %v781_v20, 1  ;;  %v787_v48 = vrot.slane %v786_v44, 2 }
 0x469   :  { %v808_v54 = vpack.c.bf16 %v776_v34, %v776_v34  ;;  %v951_v27 = vsel %vm616_vm10, %v944_v45, %v950_v15 }
 0x46a   :  { %v793_v30 = vadd.f32 %v792_v26, %v791_v39  ;;  %v798_v52 = vadd.f32 %v748_v28, %v747_v25  ;;  %v788_v32 = vadd.f32 %v787_v48, %v786_v44  ;;  %v783_v4 = vadd.f32 %v782_v14, %v781_v20  ;;  %v1298_v39 = vld [vmem:[%s2241_s9] ss:$0 sm:$0xff] }
 0x46b   :  { %v945_v49 = vunpack.c.l.b16 %v808_v54  ;;  %v1299_v28 = vld [vmem:[%s2243_s11] ss:$0 sm:$0xff] }
 0x46c   :  { %v794_v35 = vrot.slane %v793_v30, 2  ;;  %v799_v5 = vrot.slane %v798_v52, 4  ;;  %v789_v37 = vrot.slane %v788_v32, 1  ;;  %v809_v2 = vpack.c.bf16 %v783_v4, %v783_v4 }
 0x46d   :  { %v952_v1 = vsel %vm618_vm11, %v945_v49, %v951_v27 }
 0x46e   :  { %v795_v40 = vadd.f32 %v794_v35, %v793_v30  ;;  %v800_v62 = vadd.f32 %v799_v5, %v798_v52  ;;  %v790_v19 = vadd.f32 %v789_v37, %v788_v32  ;;  %v946_v53 = vunpack.c.l.b16 %v809_v2 }
 0x470   :  { %v796_v3 = vrot.slane %v795_v40, 1  ;;  %v801_v9 = vrot.slane %v800_v62, 2  ;;  %v810_v24 = vpack.c.bf16 %v790_v19, %v790_v19  ;;  %v953_v57 = vsel %vm620_vm12, %v946_v53, %v952_v1 }
 0x472   :  { %v797_v36 = vadd.f32 %v796_v3, %v795_v40  ;;  %v802_v46 = vadd.f32 %v801_v9, %v800_v62  ;;  %v947_v22 = vunpack.c.l.b16 %v810_v24 }
 0x474   :  { %v811_v12 = vpack.c.bf16 %v797_v36, %v797_v36  ;;  %v803_v51 = vrot.slane %v802_v46, 1  ;;  %v954_v58 = vsel %vm622_vm13, %v947_v22, %v953_v57 }
 0x476   :  { %v804_v55 = vadd.f32 %v803_v51, %v802_v46  ;;  %v948_v56 = vunpack.c.l.b16 %v811_v12 }
 0x478   :  { %v812_v16 = vpack.c.bf16 %v804_v55, %v804_v55  ;;  %v955_v59 = vsel %vm624_vm14, %v948_v56, %v954_v58 }
 0x47a   :  { %v949_v41 = vunpack.c.l.b16 %v812_v16 }
 0x47c   :  { %v956_v47 = vsel %vm626_vm15, %v949_v41, %v955_v59 }
 0x47d   :  { %v957_v63 = vpack.c.b16 %v956_v47, %v956_v47 }
 0x47f   :  { %1420 = vmatmul.mubr.bf16.vlgmr.msra.gmra.mrb[16].mxu0 %v957_v63 }
 0x4c2   :  { %v928_v60 = vpop.f32.mrb[0].mxu1 }
 0x4c3   :  { %v1401_v0 = vpop.f32.mrb[1].mxu1 }
 0x4c4   :  { %v931_v6 = vpop.f32.mrb[2].mxu1 }
 0x4c5   :  { %v1402_v13 = vpop.f32.mrb[3].mxu1 }
 0x552   :  { %v1041_v20 = vpop.f32.mrb[16].mxu0 }
 0x553   :  { %v1042_v8 = vadd.f32 %v1041_v20, %v928_v60  ;;  %v1421_v61 = vpop.f32.mrb[17].mxu0 }
 0x554   :  { %v1044_v44 = vpop.f32.mrb[18].mxu0 }
 0x555   :  { %v1054_v21 = vadd.f32 %v1298_v39, %v1042_v8  ;;  %v1422_v23 = vpop.f32.mrb[19].mxu0 }
 0x557   :  { %v1055_v25 = vmax.f32 %v1054_v21, 0.0 }
 0x559   :  { %v1056_v26 = vpack.c.bf16 %v1055_v25, %v1055_v25 }
 0x55b   :  { %1440 = vmatmul.mubr.bf16.vlgmr.msra.gmra.mrb[4].mxu1 %v1056_v26 }
 0x62e   :  { %v1162_v43 = vpop.f32.mrb[4].mxu1 }
 0x62f   :  { %v1163_v14 = vadd.f32 %v1299_v28, %v1162_v43  ;;  %v1441_v48 = vpop.f32.mrb[5].mxu1 }
 0x630   :  { %v1165_v17 = vpop.f32.mrb[6].mxu1 }
 0x631   :  { %v1442_v30 = vpop.f32.mrb[7].mxu1  ;;  %v1169_v52 = vsel %vm1168_vm3, %v1163_v14, -1e+09 }
 0x632   :  { %1170 = vmax.xlane.f32.xlu0 %v1169_v52 }
 0x6bf   :  { %v1171_v31 = vpop.xlane.xlu0 %1170 }
 0x6c0   :  { %v1172_v32 = vsub.f32 %v1169_v52, %v1171_v31 }
 0x6c2   :  { %v1173_v33 = vmul.f32 1.442695, %v1172_v32 }
 0x6c4   :  { %1526 = vpow2.f32 %v1173_v33 }
 0x6ce   :  { %v1527_v34 = vpop.eup %1526 }
 0x6cf   :  { %1175 = vadd.xlane.f32.xlu1 %v1527_v34 }
 0x75c   :  { %v1176_v35 = vpop.xlane.xlu1 %1175 }
 0x75d   :  { %1528 = vlog2.f32 %v1176_v35 }
 0x767   :  { %v1529_v5 = vpop.eup %1528 }
 0x768   :  { %v1178_v4 = vmul.f32 0.6931472, %v1529_v5 }
 0x76a   :  { %v1179_v37 = vadd.f32 %v1178_v4, %v1171_v31 }
 0x76c   :  { %v1180_v38 = vsub.f32 %v1169_v52, %v1179_v37 }
 0x76e   :  { %v1181_v40 = vmul.f32 1.442695, %v1180_v38  ;;  %v1185_v62 = vmul.f32 %v1184_v29, %v1180_v38 }
 0x770   :  { %1530 = vpow2.f32 %v1181_v40  ;;  %v1186_v50 = vrot.slane %v1185_v62, 4 }
 0x772   :  { %v1187_v19 = vadd.f32 %v1186_v50, %v1185_v62 }
 0x774   :  { %v1188_v42 = vrot.slane %v1187_v19, 2 }
 0x776   :  { %v1189_v54 = vadd.f32 %v1188_v42, %v1187_v19 }
 0x778   :  { %v1190_v3 = vrot.slane %v1189_v54, 1 }
 0x77a   :  { %v1531_v9 = vpop.eup %1530  ;;  %v1191_v2 = vadd.f32 %v1190_v3, %v1189_v54 }
 0x77b   :  { %1183 = vst [vmem:[#allocation14] sm:$0xff] %v1531_v9 }
 0x77c   :  { %v1192_v10 = vsub.f32 0.0, %v1191_v2 }
 0x77d   :  { %1697 = shalt.err (!%p1694_p4)
}
 0x77e   :  { %s1698_s25 = scalar_lea.hbm %s2244_s12, 128 }
 0x77f   :  { %p1699_p5 = scmp.ne.s32.totalorder %s2244_s12, %s1698_s25  ;;  %p1702_p6 = scmp.lt.u32.totalorder %s1698_s25, %s2244_s12 }
 0x781   :  { %p1704_p7 = pnand %p1702_p6, %p1699_p5 }
 0x783   :  { %1707 = shalt.err (!%p1704_p7)
}
 0x784   :  { %1204 = dma.vmem_to_hbm [thread:$0]  %s1202_s16, 128, %s2244_s12, [#allocation4]   ;;  %v1193_v24 = vmul.f32 0.125, %v1192_v10 }
 0x785   :  { %s1708_s7 = scalar_lea.vmem %s1212_s2, 16  ;;  %s1712_s4 = scalar_lea.vmem %s1212_s2, 32 }
 0x786   :  { %1194 = vst [vmem:[#allocation15] sm:$0x1] %v1193_v24  ;;  %p1709_p8 = scmp.ne.s32.totalorder %s1212_s2, %s1708_s7  ;;  %p1713_p9 = scmp.lt.s32.totalorder %s1212_s2, %s1212_s2 }
 0x787   :  { %p1714_p10 = scmp.lt.s32.totalorder %s1712_s4, %s1708_s7 }
 0x789   :  { %p1715_p11 = por %p1714_p10, %p1713_p9 }
 0x78b   :  { %p1716_p12 = pnand %p1715_p11, %p1709_p8 }
 0x78d   :  { %1719 = shalt.err (!%p1716_p12)
}
 0x78e   :  { %s1720_s5 = scalar_lea.hbm %s2245_s13, 16 }
 0x78f   :  { %p1721_p13 = scmp.ne.s32.totalorder %s2245_s13, %s1720_s5  ;;  %p1724_p0 = scmp.lt.u32.totalorder %s1720_s5, %s2245_s13 }
 0x791   :  { %p1726_p1 = pnand %p1724_p0, %p1721_p13 }
 0x793   :  { %1729 = shalt.err (!%p1726_p1)
}
 0x794   :  { %1214 = dma.vmem_to_hbm [thread:$0]  %s1212_s2, 16, %s2245_s13, [#allocation16]  }
 0x795   :  { %s1730_s9 = scalar_lea.vmem %s1222_s21, 128  ;;  %p1735_p3 = scmp.lt.s32.totalorder %s1222_s21, %s1222_s21 }
 0x796   :  { %p1731_p2 = scmp.ne.s32.totalorder %s1222_s21, %s1730_s9  ;;  %p1736_p4 = scmp.lt.s32.totalorder %s1730_s9, %s1730_s9 }
 0x798   :  { %p1737_p5 = por %p1736_p4, %p1735_p3 }
 0x79a   :  { %p1738_p6 = pnand %p1737_p5, %p1731_p2 }
 0x79c   :  { %1741 = shalt.err (!%p1738_p6)
}
 0x79d   :  { %s1742_s16 = scalar_lea.hbm %s2246_s14, 128 }
 0x79e   :  { %p1743_p7 = scmp.ne.s32.totalorder %s2246_s14, %s1742_s16  ;;  %p1746_p8 = scmp.lt.u32.totalorder %s1742_s16, %s2246_s14 }
 0x7a0   :  { %p1748_p9 = pnand %p1746_p8, %p1743_p7 }
 0x7a2   :  { %1751 = shalt.err (!%p1748_p9)
}
 0x7a3   :  { %1224 = dma.vmem_to_hbm [thread:$0]  %s1222_s21, 128, %s2246_s14, [#allocation16]  }
 0x7a4   :  { %1760 = dma.done.wait [#allocation4], 128  }
 0x7a5   :  { %1761 = vsyncadd [#allocation4], 4294967168 }
 0x7a6   :  { %1762 = dma.done.wait [#allocation16], 144  }
 0x7a7   :  { %1763 = vsyncadd [#allocation16], 4294967152 }
 0x7a8   :  { %1234 = vsyncpa [#allocation3], 1 }
 0x7a9   :  { %1235 = vsyncpa [#allocation6], 1 }
 0x7aa   :  { %1236 = vsyncpa [#allocation9], 1 }
 0x7ab   :  { %1237 = vsyncpa [#allocation12], 1 }
 0x7ac   :  { %1238 = vsyncpa [#allocation4], 1 }
 0x7ad   :  { %1239 = vsyncpa [#allocation16], 1 }

</bundles_post_ra>
